<compile_context>
chip_gen: v7x
topology: tpu7x:2x2x1
jax: 0.10.0
libtpu: 0.0.40
codegen_flags: <defaults>
</compile_context>

<pallas_src>
import functools

import jax
import jax.numpy as jnp
from jax.experimental import pallas as pl
from jax.experimental.pallas import tpu as pltpu

NEGATIVE_SLOPE = 0.01
_TARGET_BLOCK_BYTES = 2 * 1024 * 1024  # ~2 MiB/tile: big enough to hide per-step
                                       # overhead, small enough for v7x's 64 MiB VMEM
                                       # (2 in + 2 out double-buffered = ~8 MiB)


def _leaky_relu6_kernel(x_ref, o_ref, *, negative_slope):
    x = x_ref[...]
    pos = jnp.minimum(x, jnp.asarray(6.0, dtype=x.dtype))
    neg = jnp.asarray(negative_slope, dtype=x.dtype) * x
    o_ref[...] = jnp.where(x >= 0, pos, neg)


def _run_slab(x2d, negative_slope):
    """Run the elementwise kernel over a lane-dense 2-D slab (rows, width)."""
    rows, width = x2d.shape
    itemsize = jnp.dtype(x2d.dtype).itemsize

    # Pick the number of rows per block so one block is ~2 MiB (multiple of 8).
    block_rows = (_TARGET_BLOCK_BYTES // (width * itemsize)) // 8 * 8
    block_rows = max(8, block_rows)
    if block_rows >= rows:
        block_rows = rows  # single block covering the full array is always legal

    grid = (pl.cdiv(rows, block_rows),)
    kernel = functools.partial(_leaky_relu6_kernel, negative_slope=negative_slope)

    return pl.pallas_call(
        kernel,
        out_shape=jax.ShapeDtypeStruct((rows, width), x2d.dtype),
        grid_spec=pltpu.PrefetchScalarGridSpec(
            num_scalar_prefetch=0,
            grid=grid,
            in_specs=[pl.BlockSpec((block_rows, width), lambda i: (i, 0))],
            out_specs=pl.BlockSpec((block_rows, width), lambda i: (i, 0)),
        ),
        compiler_params=pltpu.CompilerParams(
            # 'parallel' lets v7x's two TensorCores split the grid loop;
            # near-neutral on single-TC v5e/v6e.
            dimension_semantics=("parallel",),
            # Explicit headroom for the double-buffered ~2 MiB in/out tiles
            # (stays below every chip's scoped-VMEM default).
            vmem_limit_bytes=24 * 1024 * 1024,
        ),
    )(x2d)


def leaky_relu6(x, negative_slope=NEGATIVE_SLOPE):
    """Elementwise LeakyReLU6 via a Pallas TPU kernel. Float dtypes only."""
    orig_shape = x.shape
    n = x.size
    if n == 0:
        return x

    # Prefer a copy-free path: reshape directly to (n // W, W) with the widest
    # lane-dense W (multiple of 128) that divides the element count.
    width = None
    for w in (1024, 512, 256, 128):
        if n % w == 0:
            width = w
            break

    if width is not None:
        x2d = x.reshape(n // width, width)          # free reshape (contiguous)
        out2d = _run_slab(x2d, negative_slope)
        return out2d.reshape(orig_shape)

    # Ragged fallback: pad the flat array up to a lane-dense slab, then trim.
    width = 1024
    n_pad = pl.cdiv(n, width) * width
    x_flat = jnp.pad(jnp.ravel(x), (0, n_pad - n))
    out2d = _run_slab(x_flat.reshape(n_pad // width, width), negative_slope)
    return out2d.reshape(-1)[:n].reshape(orig_shape)


if __name__ == "__main__":
    key = jax.random.PRNGKey(0)
    # NCHW input, scaled so values hit both the negative branch and the
    # clamp-at-6 branch.
    x = jax.random.normal(key, (2, 4, 16, 16), dtype=jnp.float32) * 5.0

    y = leaky_relu6(x)
    y = jax.block_until_ready(y)

    # Reference in plain JAX (same semantics as the torch module).
    y_ref = jnp.where(x >= 0, jnp.minimum(x, 6.0), NEGATIVE_SLOPE * x)
    assert y.shape == x.shape and y.dtype == x.dtype
    assert jnp.allclose(y, y_ref, atol=1e-6, rtol=1e-6)

    print("KERNEL_OK")
</pallas_src>

<mosaic_0001>
module attributes {stable_mosaic.version = 11 : i64} {
  func.func @_leaky_relu6_kernel(%arg0: i32, %arg1: memref<2x1024xf32, #tpu.memory_space<vmem>>, %arg2: memref<2x1024xf32, #tpu.memory_space<vmem>>) attributes {dimension_semantics = [#tpu.dimension_semantics<parallel>], iteration_bounds = array<i64: 1>, scalar_prefetch = 0 : i64, scratch_operands = 0 : i64, tpu.core_type = #tpu.core_type<tc>, window_params = [{transform_indices = @transform_0, window_bounds = array<i64: 2, 1024>}, {transform_indices = @transform_1, window_bounds = array<i64: 2, 1024>}]} {
    %c0 = arith.constant 0 : index
    %c0_0 = arith.constant 0 : index
    %0 = vector.load %arg1[%c0, %c0_0] : memref<2x1024xf32, #tpu.memory_space<vmem>>, vector<2x1024xf32>
    %cst = arith.constant 6.000000e+00 : f32
    %1 = vector.broadcast %cst : f32 to vector<2x1024xf32>
    %2 = arith.minimumf %0, %1 : vector<2x1024xf32>
    %cst_1 = arith.constant 0.00999999977 : f32
    %3 = vector.broadcast %cst_1 : f32 to vector<2x1024xf32>
    %4 = arith.mulf %3, %0 : vector<2x1024xf32>
    %cst_2 = arith.constant 0.000000e+00 : f32
    %5 = vector.broadcast %cst_2 : f32 to vector<2x1024xf32>
    %6 = arith.cmpf oge, %0, %5 : vector<2x1024xf32>
    %7 = arith.select %6, %2, %4 : vector<2x1024xi1>, vector<2x1024xf32>
    %c0_3 = arith.constant 0 : index
    %c0_4 = arith.constant 0 : index
    %8 = vector.load %arg2[%c0_3, %c0_4] : memref<2x1024xf32, #tpu.memory_space<vmem>>, vector<2x1024xf32>
    tpu.vector_store %arg2[%c0_3, %c0_4], %7 {strides = array<i32>} : memref<2x1024xf32, #tpu.memory_space<vmem>>, vector<2x1024xf32>,
    return
  }
  func.func @transform_0(%arg0: i32) -> (i32, i32) {
    %c0_i32 = arith.constant 0 : i32
    %c0_i32_0 = arith.constant 0 : i32
    return %arg0, %c0_i32 : i32, i32
  }
  func.func @transform_1(%arg0: i32) -> (i32, i32) {
    %c0_i32 = arith.constant 0 : i32
    %c0_i32_0 = arith.constant 0 : i32
    return %arg0, %c0_i32 : i32, i32
  }
}

</mosaic_0001>

<bundles_post_ra>
// kernel: tpu_custom_call.1
= control target key start
LH: loop header
LB: loop body
LE: loop exit
PB: predicated region body
PF: predicated region fallthrough
CT: control target
= control target key end

     0   :  { %6 = vsyncpa [#allocation3], 0  ;;  %s134_s0 = inlined_call_operand.hbm [shape: f32[2,1024], index: 0, kind: input, shape index: {}]   ;;  %s135_s1 = inlined_call_operand.hbm [shape: f32[2,1024], index: 1, kind: output, shape index: {}]  }
   0x1   :  { %7 = vsyncpa [#allocation4], 0  ;;  %s98_s6 = smov [#allocation2]   ;;  %s50_s10 = scalar_lea.hbm %s134_s0, 256 }
   0x2   :  { %s14_s7 = sshll.u32 %s98_s6, 4  ;;  %p51_p0 = scmp.ne.s32.totalorder %s134_s0, %s50_s10  ;;  %s15_s7 = int_to_ptr.vmem [resolvable:$true] %s14_s7 }
   0x3   :  { %p54_p1 = scmp.lt.u32.totalorder %s50_s10, %s134_s0 }
   0x5   :  { %p56_p2 = pnand %p54_p1, %p51_p0 }
   0x7   :  { %59 = shalt.err (!%p56_p2)
}
   0x8   :  { %s60_s15 = scalar_lea.vmem %s15_s7, 256  ;;  %p65_p4 = scmp.lt.s32.totalorder %s15_s7, %s15_s7 }
   0x9   :  { %p61_p3 = scmp.ne.s32.totalorder %s15_s7, %s60_s15  ;;  %p66_p5 = scmp.lt.s32.totalorder %s60_s15, %s60_s15 }
   0xb   :  { %p67_p6 = por %p66_p5, %p65_p4 }
   0xd   :  { %p68_p7 = pnand %p67_p6, %p61_p3 }
   0xf   :  { %71 = shalt.err (!%p68_p7)
}
  0x10   :  { %17 = dma.hbm_to_vmem [thread:$0]  %s134_s0, 256, %s15_s7, [#allocation3]  }
  0x11   :  { %94 = dma.done.wait [#allocation3], 256  }
  0x12   :  { %95 = vsyncadd [#allocation3], 4294967040  ;;  %v21_v0 = vld [vmem:[#allocation2] sm:$0xff]  ;;  %v22_v1 = vld [vmem:[#allocation2 + $0x8] sm:$0xff]  ;;  %s99_s18 = smov [#allocation5]  }
  0x13   :  { %s39_s19 = sshll.u32 %s99_s18, 4  ;;  %v23_v2 = vmin.f32 %v21_v0, 6.0  ;;  %v25_v3 = vmul.f32 0.01, %v21_v0  ;;  %vm27_vm0 = vcmp.ge.f32.partialorder %v21_v0, 0.0  ;;  %v24_v4 = vmin.f32 %v22_v1, 6.0  ;;  %s40_s19 = int_to_ptr.vmem [resolvable:$true] %s39_s19 }
  0x14   :  { %v26_v5 = vmul.f32 0.01, %v22_v1  ;;  %vm28_vm1 = vcmp.ge.f32.partialorder %v22_v1, 0.0  ;;  %s72_s20 = scalar_lea.vmem %s40_s19, 256  ;;  %p77_p9 = scmp.lt.s32.totalorder %s40_s19, %s40_s19 }
  0x15   :  { %v29_v6 = vsel %vm27_vm0, %v23_v2, %v25_v3  ;;  %p73_p8 = scmp.ne.s32.totalorder %s40_s19, %s72_s20  ;;  %p78_p10 = scmp.lt.s32.totalorder %s72_s20, %s72_s20 }
  0x16   :  { %31 = vst [vmem:[#allocation5] sm:$0xff] %v29_v6  ;;  %v30_v7 = vsel %vm28_vm1, %v24_v4, %v26_v5 }
  0x17   :  { %32 = vst [vmem:[#allocation5 + $0x8] sm:$0xff] %v30_v7  ;;  %p79_p11 = por %p78_p10, %p77_p9 }
  0x19   :  { %p80_p12 = pnand %p79_p11, %p73_p8 }
  0x1b   :  { %83 = shalt.err (!%p80_p12)
}
  0x1c   :  { %s84_s22 = scalar_lea.hbm %s135_s1, 256 }
  0x1d   :  { %p85_p13 = scmp.ne.s32.totalorder %s135_s1, %s84_s22  ;;  %p88_p0 = scmp.lt.u32.totalorder %s84_s22, %s135_s1 }
  0x1f   :  { %p90_p1 = pnand %p88_p0, %p85_p13 }
  0x21   :  { %93 = shalt.err (!%p90_p1)
}
  0x22   :  { %42 = dma.vmem_to_hbm [thread:$0]  %s40_s19, 256, %s135_s1, [#allocation4]  }
  0x23   :  { %96 = dma.done.wait [#allocation4], 256  }
  0x24   :  { %97 = vsyncadd [#allocation4], 4294967040 }
  0x25   :  { %46 = vsyncpa [#allocation3], 1 }
  0x26   :  { %47 = vsyncpa [#allocation4], 1 }

</bundles_post_ra>
